<compile_context>
chip_gen: v5e
topology: v5e:2x2
jax: 0.10.0
libtpu: 0.0.40
codegen_flags: <defaults>
</compile_context>

<pallas_src>
import functools

import jax
import jax.numpy as jnp
import numpy as np
from jax.experimental import pallas as pl
from jax.experimental.pallas import tpu as pltpu

EPS = 1e-5


# ----------------------------- in-kernel helpers -----------------------------

def _bn_relu(t, proj, gamma_row, beta_row, inv_count):
    """Training-mode BatchNorm + ReLU on a (rows, W*C) lane-interleaved tensor.

    proj is the (W*C, W*C) channel projector: (v @ proj)[w*C+c] = sum_w' v[w'*C+c].
    Stats are fused: one (2, L) slab of [sum(t); sum(t*t)] hits the projector in a
    single MXU push; var = E[x^2] - mean^2.
    """
    s = jnp.concatenate(
        [jnp.sum(t, axis=0, keepdims=True),
         jnp.sum(t * t, axis=0, keepdims=True)], axis=0)               # (2, L)
    st = jnp.dot(s, proj, preferred_element_type=jnp.float32) * inv_count
    mean = st[0:1, :]
    var = st[1:2, :] - mean * mean
    scale = gamma_row * jax.lax.rsqrt(var + EPS)
    return jnp.maximum((t - mean) * scale + beta_row, 0.0)


# --------------------------------- kernel ------------------------------------

def resblock_kernel(x_ref, w1_ref, w2m_ref, par_ref, p1_ref, p2_ref, o_ref, *,
                    count, H):
    R, L_in = x_ref.shape
    L_out = o_ref.shape[-1]
    inv_count = 1.0 / count

    # Per-image boundary masks for the vertical taps, hoisted once: rolls on the
    # flat (N*H, L) slab must not leak rows across image boundaries.
    h_idx = jax.lax.broadcasted_iota(jnp.int32, (R, 1), 0) % H
    m_top = (h_idx != 0).astype(jnp.float32)        # row h-1 exists
    m_bot = (h_idx != H - 1).astype(jnp.float32)    # row h+1 exists

    def shifted(t):
        # (R, L) -> (R, 3L): [row above | row | row below] with SAME zero padding
        # in H.  Rolls run on the XLU; each mask is one broadcast VPU multiply.
        up = pltpu.roll(t, shift=1, axis=0) * m_top
        dn = pltpu.roll(t, shift=R - 1, axis=0) * m_bot
        return jnp.concatenate([up, t, dn], axis=1)

    x = x_ref[...].astype(jnp.float32)

    # ---- BN1 + ReLU ----
    h1 = _bn_relu(x, p1_ref[...], par_ref[0:1, :L_in], par_ref[1:2, :L_in],
                  inv_count)

    # ---- conv1: single MXU push, K = 3*L_in.  conv1's bias is dropped: a
    # per-channel constant is exactly cancelled by BN2's mean subtraction. ----
    h = jnp.dot(shifted(h1), w1_ref[...], preferred_element_type=jnp.float32)

    # ---- BN2 + ReLU ----
    h2 = _bn_relu(h, p2_ref[...], par_ref[2:3, :L_out], par_ref[3:4, :L_out],
                  inv_count)

    # ---- conv2 + match_dim fused: single MXU push, K = 3*L_out + 3*L_in; the
    # residual add is free (shared accumulator), both biases pre-summed. ----
    lhs2 = jnp.concatenate([shifted(h2), shifted(x)], axis=1)
    out = jnp.dot(lhs2, w2m_ref[...], preferred_element_type=jnp.float32)

    o_ref[...] = (out + par_ref[4:5, :L_out]).astype(o_ref.dtype)


# ------------------------- wrapper-side layout prep ---------------------------

def _band_weights(w_hwio, W):
    """(3,3,Cin,Cout) HWIO -> (3, W*Cin, W*Cout): one banded matrix per vertical
    tap ky; the band encodes the 3 horizontal taps and SAME zero padding in W."""
    kh, kw, cin, cout = w_hwio.shape
    sel = np.zeros((kw, W, W), np.float32)          # sel[kx, wi, wo] = [wi == wo + kx - 1]
    for kx in range(kw):
        for wo in range(W):
            wi = wo + kx - 1
            if 0 <= wi < W:
                sel[kx, wi, wo] = 1.0
    band = jnp.einsum('kxio,xuw->kuiwo', w_hwio.astype(jnp.float32),
                      jnp.asarray(sel))
    return band.reshape(kh, W * cin, W * cout)


def _band_weights_stacked(w_hwio, W):
    """Banded weights with the 3 vertical taps folded into K: (3*W*Cin, W*Cout)."""
    band = _band_weights(w_hwio, W)
    return band.reshape(band.shape[0] * band.shape[1], band.shape[2])


def _chan_projector(C, W):
    """(W*C, W*C) matrix P with P[w*C+c, w'*C+c'] = [c == c']."""
    return jnp.asarray(np.tile(np.eye(C, dtype=np.float32), (W, W)))


def _lane_row(v, C, W, width):
    """Per-channel (…,C) parameter -> per-lane (1, width) row (zero-padded)."""
    r = jnp.tile(v.reshape(1, C).astype(jnp.float32), (1, W))
    return jnp.pad(r, ((0, 0), (0, width - r.shape[1])))


def resblock_forward(x, p):
    """x: (N, H, W, Cin) float32 NHWC -> (N, H, W, Cout)."""
    N, H, W, Cin = x.shape
    Cout = p["w2"].shape[-1]

    # Pad Cin with zero channels so W*Cin fills whole 128-lane vregs (4 -> 8 here).
    if (W * Cin) % 128 != 0 and 128 % W == 0:
        Cin_p = max(Cin, 128 // W)
    else:
        Cin_p = Cin
    pad_c = Cin_p - Cin

    L_in, L_out = W * Cin_p, W * Cout
    Lmax = max(L_in, L_out)

    x_p = jnp.pad(x, ((0, 0), (0, 0), (0, 0), (0, pad_c)))
    w1_p = jnp.pad(p["w1"], ((0, 0), (0, 0), (0, pad_c), (0, 0)))
    wm_p = jnp.pad(p["wm"], ((0, 0), (0, 0), (0, pad_c), (0, 0)))
    g1_p = jnp.pad(p["g1"].reshape(Cin), ((0, pad_c),))
    be1_p = jnp.pad(p["be1"].reshape(Cin), ((0, pad_c),))

    # All small per-lane parameter rows packed into ONE (8, Lmax) slab (one DMA):
    # row 0: BN1 gamma, 1: BN1 beta, 2: BN2 gamma, 3: BN2 beta,
    # row 4: fused conv2 + match_dim bias.  conv1 bias intentionally dropped.
    par = jnp.concatenate([
        _lane_row(g1_p, Cin_p, W, Lmax),
        _lane_row(be1_p, Cin_p, W, Lmax),
        _lane_row(p["g2"], Cout, W, Lmax),
        _lane_row(p["be2"], Cout, W, Lmax),
        _lane_row(p["b2"] + p["bm"], Cout, W, Lmax),
        jnp.zeros((3, Lmax), jnp.float32),
    ], axis=0)

    # conv2 and match_dim share one K-stacked weight matrix -> one MXU push.
    w2m = jnp.concatenate([_band_weights_stacked(p["w2"], W),
                           _band_weights_stacked(wm_p, W)], axis=0)

    args = (
        x_p.reshape(N * H, L_in),               # lane-dense input rows
        _band_weights_stacked(w1_p, W),          # (3*L_in, L_out)
        w2m,                                     # (3*L_out + 3*L_in, L_out)
        par,                                     # (8, Lmax) packed parameter rows
        _chan_projector(Cin_p, W),               # (L_in, L_in)
        _chan_projector(Cout, W),                # (L_out, L_out)
    )
    vmem = pl.BlockSpec(memory_space=pltpu.MemorySpace.VMEM)
    out2d = pl.pallas_call(
        functools.partial(resblock_kernel, count=N * H * W, H=H),
        out_shape=jax.ShapeDtypeStruct((N * H, L_out), jnp.float32),
        in_specs=[vmem] * len(args),
        out_specs=vmem,
    )(*args)
    return out2d.reshape(N, H, W, Cout)


# --------------------------- pure-JAX reference -------------------------------

def resblock_ref(x, p):
    def conv(x, w, b):
        y = jax.lax.conv_general_dilated(
            x, w, window_strides=(1, 1), padding="SAME",
            dimension_numbers=("NHWC", "HWIO", "NHWC"))
        return y + b

    def bn(x, g, be):
        m = jnp.mean(x, axis=(0, 1, 2), keepdims=True)
        v = jnp.mean(jnp.square(x - m), axis=(0, 1, 2), keepdims=True)
        return (x - m) / jnp.sqrt(v + EPS) * g + be

    h = jax.nn.relu(bn(x, p["g1"], p["be1"]))
    h = conv(h, p["w1"], p["b1"])
    h = jax.nn.relu(bn(h, p["g2"], p["be2"]))
    c = conv(h, p["w2"], p["b2"])
    r = conv(x, p["wm"], p["bm"])
    return c + r


# ----------------------------------- main -------------------------------------

if __name__ == "__main__":
    N, H, W = 2, 16, 16
    Cin, Cout = 4, 8

    key = jax.random.PRNGKey(0)
    keys = jax.random.split(key, 11)

    def nrm(k, shape, scale=0.1):
        return scale * jax.random.normal(k, shape, jnp.float32)

    params = {
        # BatchNorm2d(in_c): gamma, beta
        "g1":  (1.0 + nrm(keys[0], (1, 1, 1, Cin))),
        "be1": nrm(keys[1], (1, 1, 1, Cin)),
        # Conv2d(in_c, out_c, 3, padding=1): weight HWIO, bias
        "w1":  nrm(keys[2], (3, 3, Cin, Cout)),
        "b1":  nrm(keys[3], (1, 1, 1, Cout)),
        # BatchNorm2d(out_c)
        "g2":  (1.0 + nrm(keys[4], (1, 1, 1, Cout))),
        "be2": nrm(keys[5], (1, 1, 1, Cout)),
        # Conv2d(out_c, out_c, 3, padding=1)
        "w2":  nrm(keys[6], (3, 3, Cout, Cout)),
        "b2":  nrm(keys[7], (1, 1, 1, Cout)),
        # match_dim: Conv2d(in_c, out_c, 3, padding=1)
        "wm":  nrm(keys[8], (3, 3, Cin, Cout)),
        "bm":  nrm(keys[9], (1, 1, 1, Cout)),
    }

    x = jax.random.normal(keys[10], (N, H, W, Cin), jnp.float32)

    out = jax.block_until_ready(resblock_forward(x, params))
    ref = jax.block_until_ready(resblock_ref(x, params))

    assert out.shape == (N, H, W, Cout), out.shape
    assert jnp.allclose(out, ref, rtol=2e-4, atol=2e-4), float(
        jnp.max(jnp.abs(out - ref)))

    print("KERNEL_OK")
</pallas_src>

<mosaic_0001>
module attributes {stable_mosaic.version = 11 : i64} {
  func.func @resblock_kernel(%arg0: memref<32x128xf32, #tpu.memory_space<vmem>>, %arg1: memref<384x128xf32, #tpu.memory_space<vmem>>, %arg2: memref<768x128xf32, #tpu.memory_space<vmem>>, %arg3: memref<8x128xf32, #tpu.memory_space<vmem>>, %arg4: memref<128x128xf32, #tpu.memory_space<vmem>>, %arg5: memref<128x128xf32, #tpu.memory_space<vmem>>, %arg6: memref<32x128xf32, #tpu.memory_space<vmem>>) attributes {dimension_semantics = [], scalar_prefetch = 0 : i64, scratch_operands = 0 : i64, tpu.core_type = #tpu.core_type<tc>} {
    %0 = tpu.iota {dimensions = array<i32: 0>} : vector<32x1xi32>
    %c16_i32 = arith.constant 16 : i32
    %c0_i32 = arith.constant 0 : i32
    %1 = arith.cmpi eq, %c16_i32, %c0_i32 : i32
    %c1_i32 = arith.constant 1 : i32
    %2 = arith.select %1, %c1_i32, %c16_i32 : i32
    %3 = vector.broadcast %2 : i32 to vector<32x1xi32>
    %4 = arith.remsi %0, %3 : vector<32x1xi32>
    %c0_i32_0 = arith.constant 0 : i32
    %5 = vector.broadcast %c0_i32_0 : i32 to vector<32x1xi32>
    %6 = arith.cmpi ne, %4, %5 : vector<32x1xi32>
    %c0_i32_1 = arith.constant 0 : i32
    %7 = vector.broadcast %c0_i32_1 : i32 to vector<32x1xi32>
    %8 = arith.cmpi slt, %4, %7 : vector<32x1xi32>
    %c0_i32_2 = arith.constant 0 : i32
    %9 = arith.cmpi slt, %2, %c0_i32_2 : i32
    %10 = vector.broadcast %9 : i1 to vector<32x1xi1>
    %11 = vector.broadcast %10 : vector<32x1xi1> to vector<32x1xi1>
    %12 = arith.xori %8, %11 : vector<32x1xi1>
    %13 = arith.andi %12, %6 : vector<32x1xi1>
    %14 = vector.broadcast %2 : i32 to vector<32x1xi32>
    %15 = arith.addi %4, %14 : vector<32x1xi32>
    %16 = arith.select %13, %15, %4 : vector<32x1xi1>, vector<32x1xi32>
    %c0_i32_3 = arith.constant 0 : i32
    %17 = vector.broadcast %c0_i32_3 : i32 to vector<32x1xi32>
    %18 = arith.cmpi ne, %16, %17 : vector<32x1xi32>
    %19 = arith.extui %18 : vector<32x1xi1> to vector<32x1xi32>
    %20 = arith.sitofp %19 : vector<32x1xi32> to vector<32x1xf32>
    %c15_i32 = arith.constant 15 : i32
    %21 = vector.broadcast %c15_i32 : i32 to vector<32x1xi32>
    %22 = arith.cmpi ne, %16, %21 : vector<32x1xi32>
    %23 = arith.extui %22 : vector<32x1xi1> to vector<32x1xi32>
    %24 = arith.sitofp %23 : vector<32x1xi32> to vector<32x1xf32>
    %c0 = arith.constant 0 : index
    %c0_4 = arith.constant 0 : index
    %25 = vector.load %arg0[%c0, %c0_4] : memref<32x128xf32, #tpu.memory_space<vmem>>, vector<32x128xf32>
    %c0_5 = arith.constant 0 : index
    %c0_6 = arith.constant 0 : index
    %26 = vector.load %arg4[%c0_5, %c0_6] : memref<128x128xf32, #tpu.memory_space<vmem>>, vector<128x128xf32>
    %c0_7 = arith.constant 0 : index
    %c0_8 = arith.constant 0 : index
    %27 = vector.load %arg3[%c0_7, %c0_8] : memref<8x128xf32, #tpu.memory_space<vmem>>, vector<1x128xf32>
    %c1 = arith.constant 1 : index
    %c0_9 = arith.constant 0 : index
    %28 = vector.load %arg3[%c1, %c0_9] : memref<8x128xf32, #tpu.memory_space<vmem>>, vector<1x128xf32>
    %cst = arith.constant dense<0.000000e+00> : vector<128xf32>
    %29 = vector.multi_reduction <add>, %25, %cst [0] : vector<32x128xf32> to vector<128xf32>
    %30 = vector.shape_cast %29 : vector<128xf32> to vector<1x128xf32>
    %31 = arith.mulf %25, %25 : vector<32x128xf32>
    %cst_10 = arith.constant dense<0.000000e+00> : vector<128xf32>
    %32 = vector.multi_reduction <add>, %31, %cst_10 [0] : vector<32x128xf32> to vector<128xf32>
    %33 = vector.shape_cast %32 : vector<128xf32> to vector<1x128xf32>
    %34 = tpu.concatenate %30, %33 in 0 : vector<1x128xf32>, vector<1x128xf32> -> vector<2x128xf32>
    %cst_11 = arith.constant dense<0.000000e+00> : vector<2x128xf32>
    %35 = tpu.matmul %34, %26, %cst_11 {dimension_numbers = #tpu.dot_dimension_numbers<[1], [0], [0], [1], [0, 0, 1, 1], [], []>} : vector<2x128xf32>, vector<128x128xf32>, vector<2x128xf32> -> vector<2x128xf32>
    %cst_12 = arith.constant 0.001953125 : f32
    %36 = vector.broadcast %cst_12 : f32 to vector<2x128xf32>
    %37 = arith.mulf %35, %36 : vector<2x128xf32>
    %38 = vector.extract_strided_slice %37 {offsets = [0, 0], sizes = [1, 128], strides = [1, 1]} : vector<2x128xf32> to vector<1x128xf32>
    %39 = vector.extract_strided_slice %37 {offsets = [1, 0], sizes = [1, 128], strides = [1, 1]} : vector<2x128xf32> to vector<1x128xf32>
    %40 = arith.mulf %38, %38 : vector<1x128xf32>
    %41 = arith.subf %39, %40 : vector<1x128xf32>
    %cst_13 = arith.constant 9.99999974E-6 : f32
    %42 = vector.broadcast %cst_13 : f32 to vector<1x128xf32>
    %43 = arith.addf %41, %42 : vector<1x128xf32>
    %44 = math.rsqrt %43 : vector<1x128xf32>
    %45 = arith.mulf %27, %44 : vector<1x128xf32>
    %46 = vector.broadcast %38 : vector<1x128xf32> to vector<32x128xf32>
    %47 = arith.subf %25, %46 : vector<32x128xf32>
    %48 = vector.broadcast %45 : vector<1x128xf32> to vector<32x128xf32>
    %49 = arith.mulf %47, %48 : vector<32x128xf32>
    %50 = vector.broadcast %28 : vector<1x128xf32> to vector<32x128xf32>
    %51 = arith.addf %49, %50 : vector<32x128xf32>
    %cst_14 = arith.constant 0.000000e+00 : f32
    %52 = vector.broadcast %cst_14 : f32 to vector<32x128xf32>
    %53 = arith.maximumf %51, %52 : vector<32x128xf32>
    %c1_i32_15 = arith.constant 1 : i32
    %54 = tpu.dynamic_rotate %53 by %c1_i32_15 dim 0 : vector<32x128xf32>, i32 -> vector<32x128xf32>
    %55 = vector.broadcast %20 : vector<32x1xf32> to vector<32x128xf32>
    %56 = arith.mulf %54, %55 : vector<32x128xf32>
    %c31_i32 = arith.constant 31 : i32
    %57 = tpu.dynamic_rotate %53 by %c31_i32 dim 0 : vector<32x128xf32>, i32 -> vector<32x128xf32>
    %58 = vector.broadcast %24 : vector<32x1xf32> to vector<32x128xf32>
    %59 = arith.mulf %57, %58 : vector<32x128xf32>
    %60 = tpu.concatenate %56, %53, %59 in 1 : vector<32x128xf32>, vector<32x128xf32>, vector<32x128xf32> -> vector<32x384xf32>
    %c0_16 = arith.constant 0 : index
    %c0_17 = arith.constant 0 : index
    %61 = vector.load %arg1[%c0_16, %c0_17] : memref<384x128xf32, #tpu.memory_space<vmem>>, vector<384x128xf32>
    %cst_18 = arith.constant dense<0.000000e+00> : vector<32x128xf32>
    %62 = tpu.matmul %60, %61, %cst_18 {dimension_numbers = #tpu.dot_dimension_numbers<[1], [0], [0], [1], [0, 0, 1, 1], [], []>} : vector<32x384xf32>, vector<384x128xf32>, vector<32x128xf32> -> vector<32x128xf32>
    %c0_19 = arith.constant 0 : index
    %c0_20 = arith.constant 0 : index
    %63 = vector.load %arg5[%c0_19, %c0_20] : memref<128x128xf32, #tpu.memory_space<vmem>>, vector<128x128xf32>
    %c2 = arith.constant 2 : index
    %c0_21 = arith.constant 0 : index
    %64 = vector.load %arg3[%c2, %c0_21] : memref<8x128xf32, #tpu.memory_space<vmem>>, vector<1x128xf32>
    %c3 = arith.constant 3 : index
    %c0_22 = arith.constant 0 : index
    %65 = vector.load %arg3[%c3, %c0_22] : memref<8x128xf32, #tpu.memory_space<vmem>>, vector<1x128xf32>
    %cst_23 = arith.constant dense<0.000000e+00> : vector<128xf32>
    %66 = vector.multi_reduction <add>, %62, %cst_23 [0] : vector<32x128xf32> to vector<128xf32>
    %67 = vector.shape_cast %66 : vector<128xf32> to vector<1x128xf32>
    %68 = arith.mulf %62, %62 : vector<32x128xf32>
    %cst_24 = arith.constant dense<0.000000e+00> : vector<128xf32>
    %69 = vector.multi_reduction <add>, %68, %cst_24 [0] : vector<32x128xf32> to vector<128xf32>
    %70 = vector.shape_cast %69 : vector<128xf32> to vector<1x128xf32>
    %71 = tpu.concatenate %67, %70 in 0 : vector<1x128xf32>, vector<1x128xf32> -> vector<2x128xf32>
    %cst_25 = arith.constant dense<0.000000e+00> : vector<2x128xf32>
    %72 = tpu.matmul %71, %63, %cst_25 {dimension_numbers = #tpu.dot_dimension_numbers<[1], [0], [0], [1], [0, 0, 1, 1], [], []>} : vector<2x128xf32>, vector<128x128xf32>, vector<2x128xf32> -> vector<2x128xf32>
    %cst_26 = arith.constant 0.001953125 : f32
    %73 = vector.broadcast %cst_26 : f32 to vector<2x128xf32>
    %74 = arith.mulf %72, %73 : vector<2x128xf32>
    %75 = vector.extract_strided_slice %74 {offsets = [0, 0], sizes = [1, 128], strides = [1, 1]} : vector<2x128xf32> to vector<1x128xf32>
    %76 = vector.extract_strided_slice %74 {offsets = [1, 0], sizes = [1, 128], strides = [1, 1]} : vector<2x128xf32> to vector<1x128xf32>
    %77 = arith.mulf %75, %75 : vector<1x128xf32>
    %78 = arith.subf %76, %77 : vector<1x128xf32>
    %cst_27 = arith.constant 9.99999974E-6 : f32
    %79 = vector.broadcast %cst_27 : f32 to vector<1x128xf32>
    %80 = arith.addf %78, %79 : vector<1x128xf32>
    %81 = math.rsqrt %80 : vector<1x128xf32>
    %82 = arith.mulf %64, %81 : vector<1x128xf32>
    %83 = vector.broadcast %75 : vector<1x128xf32> to vector<32x128xf32>
    %84 = arith.subf %62, %83 : vector<32x128xf32>
    %85 = vector.broadcast %82 : vector<1x128xf32> to vector<32x128xf32>
    %86 = arith.mulf %84, %85 : vector<32x128xf32>
    %87 = vector.broadcast %65 : vector<1x128xf32> to vector<32x128xf32>
    %88 = arith.addf %86, %87 : vector<32x128xf32>
    %cst_28 = arith.constant 0.000000e+00 : f32
    %89 = vector.broadcast %cst_28 : f32 to vector<32x128xf32>
    %90 = arith.maximumf %88, %89 : vector<32x128xf32>
    %c1_i32_29 = arith.constant 1 : i32
    %91 = tpu.dynamic_rotate %90 by %c1_i32_29 dim 0 : vector<32x128xf32>, i32 -> vector<32x128xf32>
    %92 = vector.broadcast %20 : vector<32x1xf32> to vector<32x128xf32>
    %93 = arith.mulf %91, %92 : vector<32x128xf32>
    %c31_i32_30 = arith.constant 31 : i32
    %94 = tpu.dynamic_rotate %90 by %c31_i32_30 dim 0 : vector<32x128xf32>, i32 -> vector<32x128xf32>
    %95 = vector.broadcast %24 : vector<32x1xf32> to vector<32x128xf32>
    %96 = arith.mulf %94, %95 : vector<32x128xf32>
    %97 = tpu.concatenate %93, %90, %96 in 1 : vector<32x128xf32>, vector<32x128xf32>, vector<32x128xf32> -> vector<32x384xf32>
    %c1_i32_31 = arith.constant 1 : i32
    %98 = tpu.dynamic_rotate %25 by %c1_i32_31 dim 0 : vector<32x128xf32>, i32 -> vector<32x128xf32>
    %99 = vector.broadcast %20 : vector<32x1xf32> to vector<32x128xf32>
    %100 = arith.mulf %98, %99 : vector<32x128xf32>
    %c31_i32_32 = arith.constant 31 : i32
    %101 = tpu.dynamic_rotate %25 by %c31_i32_32 dim 0 : vector<32x128xf32>, i32 -> vector<32x128xf32>
    %102 = vector.broadcast %24 : vector<32x1xf32> to vector<32x128xf32>
    %103 = arith.mulf %101, %102 : vector<32x128xf32>
    %104 = tpu.concatenate %100, %25, %103 in 1 : vector<32x128xf32>, vector<32x128xf32>, vector<32x128xf32> -> vector<32x384xf32>
    %105 = tpu.concatenate %97, %104 in 1 : vector<32x384xf32>, vector<32x384xf32> -> vector<32x768xf32>
    %c0_33 = arith.constant 0 : index
    %c0_34 = arith.constant 0 : index
    %106 = vector.load %arg2[%c0_33, %c0_34] : memref<768x128xf32, #tpu.memory_space<vmem>>, vector<768x128xf32>
    %cst_35 = arith.constant dense<0.000000e+00> : vector<32x128xf32>
    %107 = tpu.matmul %105, %106, %cst_35 {dimension_numbers = #tpu.dot_dimension_numbers<[1], [0], [0], [1], [0, 0, 1, 1], [], []>} : vector<32x768xf32>, vector<768x128xf32>, vector<32x128xf32> -> vector<32x128xf32>
    %c4 = arith.constant 4 : index
    %c0_36 = arith.constant 0 : index
    %108 = vector.load %arg3[%c4, %c0_36] : memref<8x128xf32, #tpu.memory_space<vmem>>, vector<1x128xf32>
    %109 = vector.broadcast %108 : vector<1x128xf32> to vector<32x128xf32>
    %110 = arith.addf %107, %109 : vector<32x128xf32>
    %c0_37 = arith.constant 0 : index
    %c0_38 = arith.constant 0 : index
    %111 = vector.load %arg6[%c0_37, %c0_38] : memref<32x128xf32, #tpu.memory_space<vmem>>, vector<32x128xf32>
    tpu.vector_store %arg6[%c0_37, %c0_38], %110 {strides = array<i32>} : memref<32x128xf32, #tpu.memory_space<vmem>>, vector<32x128xf32>,
    return
  }
}

</mosaic_0001>

<bundles_post_ra>
// kernel: tpu_custom_call.1
= control target key start
LH: loop header
LB: loop body
LE: loop exit
PB: predicated region body
PF: predicated region fallthrough
CT: control target
= control target key end

     0   :  { %11 = vsyncpa [#allocation3], 0  ;;  %s1421_s0 = inlined_call_operand.hbm [shape: f32[32,128], index: 0, kind: input, shape index: {}]   ;;  %s1422_s1 = inlined_call_operand.hbm [shape: f32[384,128], index: 1, kind: input, shape index: {}]   ;;  %s1423_s2 = inlined_call_operand.hbm [shape: f32[768,128], index: 2, kind: input, shape index: {}]   ;;  %s1424_s3 = inlined_call_operand.hbm [shape: f32[8,128], index: 3, kind: input, shape index: {}]   ;;  %s1425_s4 = inlined_call_operand.hbm [shape: f32[128,128], index: 4, kind: input, shape index: {}]   ;;  %s1426_s5 = inlined_call_operand.hbm [shape: f32[128,128], index: 5, kind: input, shape index: {}]   ;;  %s1427_s6 = inlined_call_operand.hbm [shape: f32[32,128], index: 6, kind: output, shape index: {}]  }
   0x1   :  { %12 = vsyncpa [#allocation6], 0 }
   0x2   :  { %13 = vsyncpa [#allocation9], 0 }
   0x3   :  { %14 = vsyncpa [#allocation12], 0 }
   0x4   :  { %15 = vsyncpa [#allocation4], 0  ;;  %s33_s23 = sshll.u32 %s1422_s1, 4  ;;  %s1126_s24 = smov [#allocation5]   ;;  %s34_s23 = int_to_ptr.hbm [resolvable:$true] %s33_s23 }
   0x5   :  { %s35_s25 = sshll.u32 %s1126_s24, 4  ;;  %s60_s28 = sshll.u32 %s1424_s3, 4  ;;  %s36_s25 = int_to_ptr.vmem [resolvable:$true] %s35_s25  ;;  %s61_s28 = int_to_ptr.hbm [resolvable:$true] %s60_s28 }
   0x6   :  { %s1127_s29 = smov 128   ;;  %s1128_s30 = smov 8  }
   0x7   :  { %41 = dma.hbm_to_vmem [thread:$0]  %s34_s23, 6144, %s36_s25, [#allocation6], %s1127_s29, %s1127_s29, %s1128_s30  }
   0x8   :  { %s1129_s7 = smov [#allocation8]   ;;  %s20_s1 = sshll.u32 %s1421_s0, 4  ;;  %s21_s1 = int_to_ptr.hbm [resolvable:$true] %s20_s1 }
   0x9   :  { %s62_s8 = sshll.u32 %s1129_s7, 4  ;;  %s46_s3 = sshll.u32 %s1423_s2, 4  ;;  %s63_s8 = int_to_ptr.vmem [resolvable:$true] %s62_s8  ;;  %s47_s3 = int_to_ptr.hbm [resolvable:$true] %s46_s3 }
   0xa   :  { %65 = dma.hbm_to_vmem [thread:$0]  %s61_s28, 128, %s63_s8, [#allocation9]  }
   0xb   :  { %s1130_s13 = smov [#allocation2]   ;;  %s1131_s15 = smov [#allocation7]  }
   0xc   :  { %s22_s14 = sshll.u32 %s1130_s13, 4  ;;  %s48_s16 = sshll.u32 %s1131_s15, 4  ;;  %s23_s14 = int_to_ptr.vmem [resolvable:$true] %s22_s14  ;;  %s49_s16 = int_to_ptr.vmem [resolvable:$true] %s48_s16 }
   0xd   :  { %28 = dma.hbm_to_vmem [thread:$0]  %s21_s1, 512, %s23_s14, [#allocation3], %s1127_s29, %s1127_s29, %s1128_s30  }
   0xe   :  { %s70_s0 = sshll.u32 %s1425_s4, 4  ;;  %s83_s20 = sshll.u32 %s1426_s5, 4  ;;  %s71_s0 = int_to_ptr.hbm [resolvable:$true] %s70_s0  ;;  %s84_s20 = int_to_ptr.hbm [resolvable:$true] %s83_s20 }
   0xf   :  { %54 = dma.hbm_to_vmem [thread:$0]  %s47_s3, 12288, %s49_s16, [#allocation6], %s1127_s29, %s1127_s29, %s1128_s30  }
  0x10   :  { %s1132_s21 = smov [#allocation10]   ;;  %s1133_s23 = smov [#allocation11]  }
  0x11   :  { %s72_s22 = sshll.u32 %s1132_s21, 4  ;;  %s85_s4 = sshll.u32 %s1133_s23, 4  ;;  %s73_s22 = int_to_ptr.vmem [resolvable:$true] %s72_s22  ;;  %s86_s4 = int_to_ptr.vmem [resolvable:$true] %s85_s4 }
  0x12   :  { %78 = dma.hbm_to_vmem [thread:$0]  %s71_s0, 2048, %s73_s22, [#allocation9], %s1127_s29, %s1127_s29, %s1128_s30  }
  0x13   :  { %91 = dma.hbm_to_vmem [thread:$0]  %s84_s20, 2048, %s86_s4, [#allocation12], %s1127_s29, %s1127_s29, %s1128_s30  }
  0x14   :  { %1116 = dma.done.wait [#allocation3], 512  }
  0x15   :  { %1117 = vsyncadd [#allocation3], 4294966784 }
  0x16   :  { %1118 = dma.done.wait [#allocation6], 18432  }
  0x17   :  { %1119 = vsyncadd [#allocation6], 4294948864 }
  0x18   :  { %1120 = dma.done.wait [#allocation9], 2176  }
  0x19   :  { %1121 = vsyncadd [#allocation9], 4294965120 }
  0x1a   :  { %1122 = dma.done.wait [#allocation12], 2048  }
  0x1b   :  { %1123 = vsyncadd [#allocation12], 4294965248  ;;  %v212_v0 = vld [vmem:[#allocation10 + $0x78] sm:$0xff]  ;;  %v211_v1 = vld [vmem:[#allocation10 + $0x70] sm:$0xff]  ;;  %vm237_vm0 = vcmask 1040384   ;;  %s1135_s5 = smov [#allocation13]  }
  0x1c   :  { %239 = vmatpush.msra.mxu0 %v212_v0  ;;  %v210_v2 = vld [vmem:[#allocation10 + $0x68] sm:$0xff]  ;;  %v209_v3 = vld [vmem:[#allocation10 + $0x60] sm:$0xff]  ;;  %v208_v4 = vld [vmem:[#allocation10 + $0x58] sm:$0xff]  ;;  %s889_s24 = sshll.u32 %s1135_s5, 4  ;;  %s891_s27 = sshll.u32 %s1427_s6, 4  ;;  %s890_s24 = int_to_ptr.vmem [resolvable:$true] %s889_s24  ;;  %s892_s27 = int_to_ptr.hbm [resolvable:$true] %s891_s27 }
  0x1d   :  { %v1204_v5 = vld [vmem:[#allocation2] sm:$0xff]  ;;  %v1206_v6 = vld [vmem:[#allocation2 + $0x8] sm:$0xff]  ;;  %v1208_v7 = vld [vmem:[#allocation2 + $0x10] sm:$0xff] }
  0x1e   :  { %240 = vmatpush.msra.mxu0 %v211_v1  ;;  %v1210_v8 = vld [vmem:[#allocation2 + $0x18] sm:$0xff]  ;;  %v215_v9 = vadd.f32 %v1206_v6, %v1204_v5  ;;  %v224_v10 = vmul.f32 %v1204_v5, %v1204_v5  ;;  %v225_v11 = vmul.f32 %v1206_v6, %v1206_v6  ;;  %v226_v12 = vmul.f32 %v1208_v7, %v1208_v7  ;;  %v206_v17 = vld [vmem:[#allocation10 + $0x48] sm:$0xff]  ;;  %v205_v20 = vld [vmem:[#allocation10 + $0x40] sm:$0xff] }
  0x1f   :  { %v207_v13 = vld [vmem:[#allocation10 + $0x50] sm:$0xff]  ;;  %v227_v15 = vmul.f32 %v1210_v8, %v1210_v8  ;;  %v204_v23 = vld [vmem:[#allocation10 + $0x38] sm:$0xff]  ;;  %v202_v29 = vld [vmem:[#allocation10 + $0x28] sm:$0xff] }
  0x20   :  { %241 = vmatpush.msra.mxu0 %v210_v2  ;;  %v216_v14 = vadd.f32 %v215_v9, %v1208_v7  ;;  %v228_v16 = vadd.f32 %v225_v11, %v224_v10  ;;  %v203_v26 = vld [vmem:[#allocation10 + $0x30] sm:$0xff]  ;;  %v201_v32 = vld [vmem:[#allocation10 + $0x20] sm:$0xff]  ;;  %v200_v35 = vld [vmem:[#allocation10 + $0x18] sm:$0xff] }
  0x21   :  { %v199_v37 = vld [vmem:[#allocation10 + $0x10] sm:$0xff]  ;;  %v198_v40 = vld [vmem:[#allocation10 + $0x8] sm:$0xff]  ;;  %v197_v41 = vld [vmem:[#allocation10] sm:$0xff] }
  0x22   :  { %242 = vmatpush.msra.mxu0 %v209_v3  ;;  %v217_v18 = vadd.f32 %v216_v14, %v1210_v8  ;;  %v229_v19 = vadd.f32 %v228_v16, %v226_v12  ;;  %v356_v43 = vld [vmem:[#allocation5 + $0xf8] sm:$0xff]  ;;  %v355_v44 = vld [vmem:[#allocation5 + $0xf0] sm:$0xff]  ;;  %v354_v46 = vld [vmem:[#allocation5 + $0xe8] sm:$0xff] }
  0x23   :  { %402 = vmatpush.msra.mxu2 %v356_v43  ;;  %v372_v45 = vld [vmem:[#allocation5 + $0x178] sm:$0xff]  ;;  %v371_v48 = vld [vmem:[#allocation5 + $0x170] sm:$0xff]  ;;  %v353_v49 = vld [vmem:[#allocation5 + $0xe0] sm:$0xff]  ;;  %v116_v43 = vlaneseq }
  0x24   :  { %243 = vmatpush.msra.mxu0 %v208_v4  ;;  %v218_v21 = vrot.slane %v217_v18, 4  ;;  %v230_v22 = vadd.f32 %v229_v19, %v227_v15  ;;  %431 = vmatpush.msra.mxu3 %v372_v45  ;;  %v340_v47 = vld [vmem:[#allocation5 + $0x78] sm:$0xff]  ;;  %v339_v50 = vld [vmem:[#allocation5 + $0x70] sm:$0xff]  ;;  %v370_v51 = vld [vmem:[#allocation5 + $0x168] sm:$0xff] }
  0x25   :  { %403 = vmatpush.msra.mxu2 %v355_v44  ;;  %373 = vmatpush.msra.mxu1 %v340_v47  ;;  %v352_v52 = vld [vmem:[#allocation5 + $0xd8] sm:$0xff]  ;;  %v338_v53 = vld [vmem:[#allocation5 + $0x68] sm:$0xff]  ;;  %v369_v54 = vld [vmem:[#allocation5 + $0x160] sm:$0xff] }
  0x26   :  { %244 = vmatpush.msra.mxu0 %v207_v13  ;;  %v219_v24 = vadd.f32 %v218_v21, %v217_v18  ;;  %v231_v25 = vrot.slane %v230_v22, 4  ;;  %432 = vmatpush.msra.mxu3 %v371_v48  ;;  %v351_v55 = vld [vmem:[#allocation5 + $0xd0] sm:$0xff]  ;;  %v337_v56 = vld [vmem:[#allocation5 + $0x60] sm:$0xff]  ;;  %v368_v57 = vld [vmem:[#allocation5 + $0x158] sm:$0xff]  ;;  %v1225_v48 = vshrl.u32 %v116_v43, 7 }
  0x27   :  { %404 = vmatpush.msra.mxu2 %v354_v46  ;;  %374 = vmatpush.msra.mxu1 %v339_v50  ;;  %v350_v58 = vld [vmem:[#allocation5 + $0xc8] sm:$0xff]  ;;  %v336_v59 = vld [vmem:[#allocation5 + $0x58] sm:$0xff]  ;;  %v367_v60 = vld [vmem:[#allocation5 + $0x150] sm:$0xff] }
  0x28   :  { %245 = vmatpush.msra.mxu0 %v206_v17  ;;  %v220_v27 = vrot.slane %v219_v24, 2  ;;  %v232_v28 = vadd.f32 %v231_v25, %v230_v22  ;;  %433 = vmatpush.msra.mxu3 %v370_v51  ;;  %v349_v61 = vld [vmem:[#allocation5 + $0xc0] sm:$0xff]  ;;  %v335_v62 = vld [vmem:[#allocation5 + $0x50] sm:$0xff]  ;;  %v366_v63 = vld [vmem:[#allocation5 + $0x148] sm:$0xff]  ;;  %v125_v51 = vand.u32 15, %v1225_v48  ;;  %vm316_vm5 = vcmp.lt.s32.totalorder %v1225_v48, 7 }
  0x29   :  { %405 = vmatpush.msra.mxu2 %v353_v49  ;;  %375 = vmatpush.msra.mxu1 %v338_v53  ;;  %v348_v0 = vld [vmem:[#allocation5 + $0xb8] sm:$0xff]  ;;  %v334_v1 = vld [vmem:[#allocation5 + $0x48] sm:$0xff]  ;;  %v365_v2 = vld [vmem:[#allocation5 + $0x140] sm:$0xff]  ;;  %vm303_vm6 = vcmp.lt.s32.totalorder %v1225_v48, 1 }
  0x2a   :  { %246 = vmatpush.msra.mxu0 %v205_v20  ;;  %v221_v30 = vadd.f32 %v220_v27, %v219_v24  ;;  %v233_v31 = vrot.slane %v232_v28, 2  ;;  %434 = vmatpush.msra.mxu3 %v369_v54  ;;  %v347_v3 = vld [vmem:[#allocation5 + $0xb0] sm:$0xff]  ;;  %v333_v4 = vld [vmem:[#allocation5 + $0x40] sm:$0xff]  ;;  %v364_v9 = vld [vmem:[#allocation5 + $0x138] sm:$0xff]  ;;  %vm169_vm4 = vcmp.ne.s32.totalorder %v125_v51, 0 }
  0x2b   :  { %406 = vmatpush.msra.mxu2 %v352_v52  ;;  %376 = vmatpush.msra.mxu1 %v337_v56  ;;  %v346_v10 = vld [vmem:[#allocation5 + $0xa8] sm:$0xff]  ;;  %v332_v11 = vld [vmem:[#allocation5 + $0x38] sm:$0xff]  ;;  %v363_v12 = vld [vmem:[#allocation5 + $0x130] sm:$0xff] }
  0x2c   :  { %247 = vmatpush.msra.mxu0 %v204_v23  ;;  %v234_v33 = vadd.f32 %v233_v31, %v232_v28  ;;  %v222_v34 = vrot.slane %v221_v30, 1  ;;  %435 = vmatpush.msra.mxu3 %v368_v57  ;;  %v345_v13 = vld [vmem:[#allocation5 + $0xa0] sm:$0xff]  ;;  %v331_v14 = vld [vmem:[#allocation5 + $0x30] sm:$0xff]  ;;  %v362_v15 = vld [vmem:[#allocation5 + $0x128] sm:$0xff] }
  0x2d   :  { %407 = vmatpush.msra.mxu2 %v351_v55  ;;  %377 = vmatpush.msra.mxu1 %v336_v59  ;;  %v344_v16 = vld [vmem:[#allocation5 + $0x98] sm:$0xff]  ;;  %v330_v18 = vld [vmem:[#allocation5 + $0x28] sm:$0xff]  ;;  %v361_v19 = vld [vmem:[#allocation5 + $0x120] sm:$0xff] }
  0x2e   :  { %248 = vmatpush.msra.mxu0 %v203_v26  ;;  %v235_v36 = vrot.slane %v234_v33, 1  ;;  %v223_v38 = vadd.f32 %v222_v34, %v221_v30  ;;  %436 = vmatpush.msra.mxu3 %v367_v60  ;;  %v343_v21 = vld [vmem:[#allocation5 + $0x90] sm:$0xff]  ;;  %v329_v22 = vld [vmem:[#allocation5 + $0x20] sm:$0xff]  ;;  %v360_v23 = vld [vmem:[#allocation5 + $0x118] sm:$0xff] }
  0x2f   :  { %408 = vmatpush.msra.mxu2 %v350_v58  ;;  %378 = vmatpush.msra.mxu1 %v335_v62  ;;  %v342_v25 = vld [vmem:[#allocation5 + $0x88] sm:$0xff]  ;;  %v328_v26 = vld [vmem:[#allocation5 + $0x18] sm:$0xff]  ;;  %v359_v27 = vld [vmem:[#allocation5 + $0x110] sm:$0xff] }
  0x30   :  { %249 = vmatpush.msra.mxu0 %v202_v29  ;;  %v236_v39 = vadd.f32 %v235_v36, %v234_v33  ;;  %437 = vmatpush.msra.mxu3 %v366_v63  ;;  %v341_v29 = vld [vmem:[#allocation5 + $0x80] sm:$0xff]  ;;  %v327_v30 = vld [vmem:[#allocation5 + $0x10] sm:$0xff]  ;;  %v358_v33 = vld [vmem:[#allocation5 + $0x108] sm:$0xff] }
  0x31   :  { %409 = vmatpush.msra.mxu2 %v349_v61  ;;  %379 = vmatpush.msra.mxu1 %v334_v1  ;;  %v326_v34 = vld [vmem:[#allocation5 + $0x8] sm:$0xff]  ;;  %v325_v36 = vld [vmem:[#allocation5] sm:$0xff]  ;;  %v118_v61 = vadd.s32 8, %v1225_v48  ;;  %v470_v43 = vld [vmem:[#allocation11 + $0x50] sm:$0xff] }
  0x32   :  { %250 = vmatpush.msra.mxu0 %v201_v32  ;;  %v238_v42 = vsel %vm237_vm0, %v223_v38, %v236_v39  ;;  %438 = vmatpush.msra.mxu3 %v365_v2  ;;  %v213_v46 = vld [vmem:[#allocation8] sm:$0x1]  ;;  %v937_v56 = vld [vmem:[#allocation8 + $0x1] ss:$0 sm:$0xff]  ;;  %v466_v51 = vld [vmem:[#allocation11 + $0x30] sm:$0xff] }
  0x33   :  { %410 = vmatpush.msra.mxu2 %v348_v0  ;;  %380 = vmatpush.msra.mxu1 %v333_v4  ;;  %v1134_v4 = vmov 0.0  }
  0x34   :  { %251 = vmatpush.msra.mxu0 %v200_v35  ;;  %439 = vmatpush.msra.mxu3 %v364_v9  ;;  %v357_v35 = vld [vmem:[#allocation5 + $0x100] sm:$0xff]  ;;  %v1234_v9 = vsel %vm169_vm4, 1.0, %v1134_v4 }
  0x35   :  { %411 = vmatpush.msra.mxu2 %v347_v3  ;;  %381 = vmatpush.msra.mxu1 %v332_v11 }
  0x36   :  { %252 = vmatpush.msra.mxu0 %v199_v37  ;;  %440 = vmatpush.msra.mxu3 %v363_v12 }
  0x37   :  { %412 = vmatpush.msra.mxu2 %v346_v10  ;;  %382 = vmatpush.msra.mxu1 %v331_v14  ;;  %v132_v10 = vand.u32 15, %v118_v61 }
  0x38   :  { %253 = vmatpush.msra.mxu0 %v198_v40  ;;  %441 = vmatpush.msra.mxu3 %v362_v15 }
  0x39   :  { %413 = vmatpush.msra.mxu2 %v345_v13  ;;  %383 = vmatpush.msra.mxu1 %v330_v18  ;;  %vm182_vm7 = vcmp.ne.s32.totalorder %v132_v10, 15 }
  0x3a   :  { %254 = vmatpush.msra.mxu0 %v197_v41  ;;  %442 = vmatpush.msra.mxu3 %v361_v19  ;;  %v119_v19 = vadd.s32 16, %v1225_v48 }
  0x3b   :  { %255 = vmatmul.f32.vlgmr.msra.gmra.mxu0 %v238_v42  ;;  %414 = vmatpush.msra.mxu2 %v344_v16 }
  0x3c   :  { %384 = vmatpush.msra.mxu1 %v329_v22  ;;  %443 = vmatpush.msra.mxu3 %v360_v23 }
  0x3d   :  { %415 = vmatpush.msra.mxu2 %v343_v21 }
  0x3e   :  { %385 = vmatpush.msra.mxu1 %v328_v26  ;;  %444 = vmatpush.msra.mxu3 %v359_v27 }
  0x3f   :  { %416 = vmatpush.msra.mxu2 %v342_v25  ;;  %v120_v25 = vadd.s32 24, %v1225_v48 }
  0x40   :  { %386 = vmatpush.msra.mxu1 %v327_v30  ;;  %445 = vmatpush.msra.mxu3 %v358_v33 }
  0x41   :  { %417 = vmatpush.msra.mxu2 %v341_v29  ;;  %v146_v29 = vand.u32 15, %v120_v25 }
  0x42   :  { %387 = vmatpush.msra.mxu1 %v326_v34  ;;  %446 = vmatpush.msra.mxu3 %v357_v35 }
  0x43   :  { %vm184_vm9 = vcmp.ne.s32.totalorder %v146_v29, 15 }
  0x44   :  { %388 = vmatpush.msra.mxu1 %v325_v36  ;;  %v1258_v34 = vsel %vm184_vm9, 1.0, %v1134_v4 }
  0xb8   :  { %v256_v17 = vpop.f32.mrf.mxu0 }
  0xb9   :  { %v259_v20 = vmul.f32 0.001953125, %v256_v17 }
  0xbb   :  { %v260_v24 = vmul.f32 %v259_v20, %v259_v20  ;;  %v280_v45 = vperm.slane %v259_v20, 0 }
  0xbd   :  { %v262_v28 = vrot.slane %v260_v24, 7  ;;  %v282_v50 = vsub.f32 %v1206_v6, %v280_v45  ;;  %v283_v52 = vsub.f32 %v1208_v7, %v280_v45  ;;  %v284_v53 = vsub.f32 %v1210_v8, %v280_v45 }
  0xbe   :  { %v281_v54 = vsub.f32 %v1204_v5, %v280_v45  ;;  %v139_v24 = vand.u32 15, %v119_v19 }
  0xbf   :  { %v264_v31 = vsub.f32 %v259_v20, %v262_v28  ;;  %v1243_v20 = vsel %vm182_vm7, 1.0, %v1134_v4 }
  0xc0   :  { %vm171_vm8 = vcmp.ne.s32.totalorder %v139_v24, 0 }
  0xc1   :  { %v265_v32 = vadd.f32 1e-05, %v264_v31  ;;  %v1251_v30 = vsel %vm171_vm8, 1.0, %v1134_v4 }
  0xc3   :  { %940 = vrsqrt.f32 %v265_v32  ;;  %vm272_vm2 = vweird.f32 %v265_v32 }
  0xc9   :  { %v941_v37 = vpop.eup %940 }
  0xca   :  { %v267_v38 = vmul.f32 %v941_v37, %v265_v32  ;;  %vm273_vm1 = vweird.f32 %v941_v37 }
  0xcb   :  { %vm274_vm3 = vmor %vm272_vm2, %vm273_vm1 }
  0xcc   :  { %v268_v39 = vmul.f32 %v941_v37, %v267_v38  ;;  %v475_v38 = vld [vmem:[#allocation11 + $0x78] sm:$0xff] }
  0xcd   :  { %501 = vmatpush.msrb.mxu0 %v475_v38 }
  0xce   :  { %v269_v40 = vmul.f32 0.5, %v268_v39  ;;  %v474_v39 = vld [vmem:[#allocation11 + $0x70] sm:$0xff] }
  0xcf   :  { %502 = vmatpush.msrb.mxu0 %v474_v39 }
  0xd0   :  { %v270_v41 = vsub.f32 1.5, %v269_v40  ;;  %v473_v40 = vld [vmem:[#allocation11 + $0x68] sm:$0xff] }
  0xd1   :  { %503 = vmatpush.msrb.mxu0 %v473_v40  ;;  %v640_v40 = vld [vmem:[#allocation7 + $0xf8] sm:$0xff] }
  0xd2   :  { %v271_v42 = vmul.f32 %v941_v37, %v270_v41  ;;  %v472_v41 = vld [vmem:[#allocation11 + $0x60] sm:$0xff]  ;;  %736 = vmatpush.msrb.mxu2 %v640_v40  ;;  %v612_v40 = vld [vmem:[#allocation7 + $0x18] sm:$0xff] }
  0xd3   :  { %504 = vmatpush.msrb.mxu0 %v472_v41  ;;  %v639_v41 = vld [vmem:[#allocation7 + $0xf0] sm:$0xff] }
  0xd4   :  { %v275_v44 = vsel %vm274_vm3, %v941_v37, %v271_v42  ;;  %v471_v42 = vld [vmem:[#allocation11 + $0x58] sm:$0xff]  ;;  %737 = vmatpush.msrb.mxu2 %v639_v41  ;;  %v643_v41 = vld [vmem:[#allocation7 + $0x110] sm:$0xff] }
  0xd5   :  { %v277_v47 = vrot.slane %v275_v44, 1  ;;  %505 = vmatpush.msrb.mxu0 %v471_v42  ;;  %v469_v44 = vld [vmem:[#allocation11 + $0x48] sm:$0xff]  ;;  %v656_v42 = vld [vmem:[#allocation7 + $0x178] sm:$0xff] }
  0xd6   :  { %765 = vmatpush.msrb.mxu3 %v656_v42 }
  0xd7   :  { %v279_v49 = vmul.f32 %v277_v47, %v213_v46  ;;  %506 = vmatpush.msrb.mxu0 %v470_v43  ;;  %v468_v46 = vld [vmem:[#allocation11 + $0x40] sm:$0xff] }
  0xd8   :  { %v638_v43 = vld [vmem:[#allocation7 + $0xe8] sm:$0xff] }
  0xd9   :  { %v285_v55 = vperm.slane %v279_v49, 0  ;;  %507 = vmatpush.msrb.mxu0 %v469_v44  ;;  %v467_v49 = vld [vmem:[#allocation11 + $0x38] sm:$0xff]  ;;  %v624_v44 = vld [vmem:[#allocation7 + $0x78] sm:$0xff]  ;;  %738 = vmatpush.msrb.mxu2 %v638_v43  ;;  %v1317_v43 = vld [vmem:[#allocation7 + $0x1b0] sm:$0xff] }
  0xda   :  { %707 = vmatpush.msrb.mxu1 %v624_v44  ;;  %v625_v44 = vld [vmem:[#allocation7 + $0x80] sm:$0xff] }
  0xdb   :  { %v286_v57 = vmul.f32 %v285_v55, %v281_v54  ;;  %v287_v58 = vmul.f32 %v285_v55, %v282_v50  ;;  %v289_v59 = vmul.f32 %v285_v55, %v284_v53  ;;  %v288_v60 = vmul.f32 %v285_v55, %v283_v52  ;;  %508 = vmatpush.msrb.mxu0 %v468_v46  ;;  %v465_v52 = vld [vmem:[#allocation11 + $0x28] sm:$0xff]  ;;  %v464_v53 = vld [vmem:[#allocation11 + $0x20] sm:$0xff]  ;;  %v463_v55 = vld [vmem:[#allocation11 + $0x18] sm:$0xff] }
  0xdc   :  { %v637_v46 = vld [vmem:[#allocation7 + $0xe0] sm:$0xff] }
  0xdd   :  { %v291_v62 = vadd.f32 %v937_v56, %v286_v57  ;;  %v292_v63 = vadd.f32 %v937_v56, %v287_v58  ;;  %v294_v6 = vadd.f32 %v937_v56, %v289_v59  ;;  %v293_v0 = vadd.f32 %v937_v56, %v288_v60  ;;  %509 = vmatpush.msrb.mxu0 %v467_v49  ;;  %v462_v57 = vld [vmem:[#allocation11 + $0x10] sm:$0xff]  ;;  %v461_v59 = vld [vmem:[#allocation11 + $0x8] sm:$0xff]  ;;  %v460_v60 = vld [vmem:[#allocation11] sm:$0xff] }
  0xde   :  { %739 = vmatpush.msrb.mxu2 %v637_v46  ;;  %v654_v49 = vld [vmem:[#allocation7 + $0x168] sm:$0xff] }
  0xdf   :  { %v295_v1 = vmax.f32 %v291_v62, 0.0  ;;  %v296_v2 = vmax.f32 %v292_v63, 0.0  ;;  %v298_v7 = vmax.f32 %v294_v6, 0.0  ;;  %v297_v3 = vmax.f32 %v293_v0, 0.0  ;;  %510 = vmatpush.msrb.mxu0 %v466_v51  ;;  %v622_v51 = vld [vmem:[#allocation7 + $0x68] sm:$0xff] }
  0xe1   :  { %418 = vmatmul.f32.vlgmr.msra.gmra.mxu2 %v295_v1  ;;  %v312_v11 = vrot.slane %v295_v1, 1  ;;  %v313_v12 = vrot.slane %v296_v2, 1  ;;  %v299_v13 = vrot.slane %v295_v1, 7  ;;  %v302_v14 = vrot.slane %v298_v7, 7  ;;  %511 = vmatpush.msrb.mxu0 %v465_v52  ;;  %v653_v52 = vld [vmem:[#allocation7 + $0x160] sm:$0xff] }
  0xe2   :  { %v314_v17 = vrot.slane %v297_v3, 1  ;;  %v300_v22 = vrot.slane %v296_v2, 7  ;;  %v301_v27 = vrot.slane %v297_v3, 7  ;;  %v315_v28 = vrot.slane %v298_v7, 1 }
  0xe3   :  { %v319_v15 = vsel %vm316_vm5, %v312_v11, %v313_v12  ;;  %v307_v16 = vsel %vm303_vm6, %v302_v14, %v299_v13  ;;  %512 = vmatpush.msrb.mxu0 %v464_v53  ;;  %v635_v53 = vld [vmem:[#allocation7 + $0xd0] sm:$0xff] }
  0xe4   :  { %447 = vmatmul.f32.vlgmr.msra.gmra.mxu3 %v319_v15  ;;  %v308_v18 = vmul.f32 %v1234_v9, %v307_v16  ;;  %v318_v21 = vsel %vm316_vm5, %v313_v12, %v314_v17  ;;  %v306_v26 = vsel %vm303_vm6, %v299_v13, %v300_v22  ;;  %v305_v31 = vsel %vm303_vm6, %v300_v22, %v301_v27 }
  0xe5   :  { %v322_v23 = vmul.f32 %v1243_v20, %v318_v21  ;;  %v317_v32 = vsel %vm316_vm5, %v314_v17, %v315_v28  ;;  %v310_v33 = vmul.f32 %v1251_v30, %v305_v31  ;;  %v320_v35 = vsel %vm316_vm5, %v315_v28, %v312_v11  ;;  %513 = vmatpush.msrb.mxu0 %v463_v55  ;;  %v652_v55 = vld [vmem:[#allocation7 + $0x158] sm:$0xff] }
  0xe6   :  { %389 = vmatmul.f32.vlgmr.msra.gmra.mxu1 %v308_v18  ;;  %v324_v36 = vmul.f32 %v1258_v34, %v320_v35  ;;  %v304_v37 = vsel %vm303_vm6, %v301_v27, %v302_v14 }
  0xe7   :  { %514 = vmatpush.msrb.mxu0 %v462_v57  ;;  %v634_v57 = vld [vmem:[#allocation7 + $0xc8] sm:$0xff] }
  0xe9   :  { %421 = vmatmul.f32.gmra.mxu2 %v296_v2  ;;  %515 = vmatpush.msrb.mxu0 %v461_v59  ;;  %v651_v59 = vld [vmem:[#allocation7 + $0x150] sm:$0xff] }
  0xeb   :  { %516 = vmatpush.msrb.mxu0 %v460_v60  ;;  %v1289_v60 = vld [vmem:[#allocation7 + $0x1f0] sm:$0xff] }
  0xec   :  { %450 = vmatmul.f32.gmra.mxu3 %v322_v23 }
  0xee   :  { %392 = vmatmul.f32.gmra.mxu1 %v306_v26 }
  0xf1   :  { %424 = vmatmul.f32.gmra.mxu2 %v297_v3 }
  0xf4   :  { %453 = vmatmul.f32.gmra.mxu3 %v317_v32 }
  0xf6   :  { %395 = vmatmul.f32.gmra.mxu1 %v310_v33 }
  0xf9   :  { %427 = vmatmul.f32.gmra.mxu2 %v298_v7 }
  0xfc   :  { %456 = vmatmul.f32.gmra.mxu3 %v324_v36 }
  0xfe   :  { %398 = vmatmul.f32.gmra.mxu1 %v304_v37 }
 0x163   :  { %v390_v45 = vpop.f32.mrf.mxu1 }
 0x164   :  { %v419_v47 = vpop.f32.mrf.mxu2 }
 0x165   :  { %v420_v6 = vadd.f32 %v419_v47, %v390_v45  ;;  %v655_v45 = vld [vmem:[#allocation7 + $0x170] sm:$0xff] }
 0x166   :  { %766 = vmatpush.msrb.mxu3 %v655_v45  ;;  %v623_v47 = vld [vmem:[#allocation7 + $0x70] sm:$0xff] }
 0x167   :  { %v448_v50 = vpop.f32.mrf.mxu3  ;;  %708 = vmatpush.msrb.mxu1 %v623_v47  ;;  %v611_v45 = vld [vmem:[#allocation7 + $0x10] sm:$0xff]  ;;  %v642_v47 = vld [vmem:[#allocation7 + $0x108] sm:$0xff] }
 0x168   :  { %v1267_v7 = vadd.f32 %v448_v50, %v420_v6  ;;  %767 = vmatpush.msrb.mxu3 %v654_v49  ;;  %v636_v50 = vld [vmem:[#allocation7 + $0xd8] sm:$0xff]  ;;  %v1292_v6 = vld [vmem:[#allocation7 + $0x1e8] sm:$0xff] }
 0x169   :  { %740 = vmatpush.msrb.mxu2 %v636_v50  ;;  %709 = vmatpush.msrb.mxu1 %v622_v51  ;;  %v1322_v49 = vld [vmem:[#allocation7 + $0x1a8] sm:$0xff]  ;;  %v704_v51 = vld [vmem:[#allocation7 + $0x2f8] sm:$0xff] }
 0x16a   :  { %v487_v13 = vmul.f32 %v1267_v7, %v1267_v7  ;;  %768 = vmatpush.msrb.mxu3 %v653_v52  ;;  %v610_v50 = vld [vmem:[#allocation7 + $0x8] sm:$0xff]  ;;  %v641_v52 = vld [vmem:[#allocation7 + $0x100] sm:$0xff] }
 0x16b   :  { %v393_v54 = vpop.f32.mrf.mxu1  ;;  %741 = vmatpush.msrb.mxu2 %v635_v53  ;;  %v1326_v53 = vld [vmem:[#allocation7 + $0x1a0] sm:$0xff] }
 0x16c   :  { %v422_v56 = vpop.f32.mrf.mxu2  ;;  %769 = vmatpush.msrb.mxu3 %v652_v55  ;;  %v588_v55 = vrot.slane %v1210_v8, 7 }
 0x16d   :  { %v423_v62 = vadd.f32 %v422_v56, %v393_v54  ;;  %v621_v54 = vld [vmem:[#allocation7 + $0x60] sm:$0xff]  ;;  %v1286_v56 = vld [vmem:[#allocation7 + $0x1f8] sm:$0xff]  ;;  %742 = vmatpush.msrb.mxu2 %v634_v57 }
 0x16e   :  { %710 = vmatpush.msrb.mxu1 %v621_v54  ;;  %794 = vmatpush.msra.mxu0 %v1286_v56  ;;  %v585_v54 = vrot.slane %v1204_v5, 7  ;;  %v609_v57 = vld [vmem:[#allocation7] sm:$0xff] }
 0x16f   :  { %v451_v58 = vpop.f32.mrf.mxu3  ;;  %770 = vmatpush.msrb.mxu3 %v651_v59  ;;  %v1331_v59 = vld [vmem:[#allocation7 + $0x198] sm:$0xff] }
 0x170   :  { %v1265_v2 = vadd.f32 %v451_v58, %v423_v62  ;;  %v620_v58 = vld [vmem:[#allocation7 + $0x58] sm:$0xff]  ;;  %795 = vmatpush.msra.mxu0 %v1289_v60  ;;  %v619_v62 = vld [vmem:[#allocation7 + $0x50] sm:$0xff] }
 0x171   :  { %711 = vmatpush.msrb.mxu1 %v620_v58  ;;  %v703_v58 = vld [vmem:[#allocation7 + $0x2f0] sm:$0xff] }
 0x172   :  { %v488_v10 = vmul.f32 %v1265_v2, %v1265_v2  ;;  %v478_v14 = vadd.f32 %v1265_v2, %v1267_v7  ;;  %796 = vmatpush.msra.mxu0 %v1292_v6 }
 0x173   :  { %v396_v61 = vpop.f32.mrf.mxu1  ;;  %712 = vmatpush.msrb.mxu1 %v619_v62  ;;  %v702_v62 = vld [vmem:[#allocation7 + $0x2e8] sm:$0xff] }
 0x174   :  { %v425_v63 = vpop.f32.mrf.mxu2  ;;  %v491_v17 = vadd.f32 %v488_v10, %v487_v13  ;;  %v1295_v10 = vld [vmem:[#allocation7 + $0x1e0] sm:$0xff]  ;;  %v648_v13 = vld [vmem:[#allocation7 + $0x138] sm:$0xff] }
 0x175   :  { %v426_v0 = vadd.f32 %v425_v63, %v396_v61  ;;  %v633_v61 = vld [vmem:[#allocation7 + $0xc0] sm:$0xff]  ;;  %v650_v63 = vld [vmem:[#allocation7 + $0x148] sm:$0xff]  ;;  %797 = vmatpush.msra.mxu0 %v1295_v10 }
 0x176   :  { %743 = vmatpush.msrb.mxu2 %v633_v61  ;;  %771 = vmatpush.msrb.mxu3 %v650_v63  ;;  %v688_v61 = vld [vmem:[#allocation7 + $0x278] sm:$0xff]  ;;  %v1335_v63 = vld [vmem:[#allocation7 + $0x190] sm:$0xff] }
 0x177   :  { %v454_v1 = vpop.f32.mrf.mxu3 }
 0x178   :  { %v1269_v3 = vadd.f32 %v454_v1, %v426_v0  ;;  %v632_v0 = vld [vmem:[#allocation7 + $0xb8] sm:$0xff]  ;;  %v618_v1 = vld [vmem:[#allocation7 + $0x48] sm:$0xff] }
 0x179   :  { %744 = vmatpush.msrb.mxu2 %v632_v0  ;;  %713 = vmatpush.msrb.mxu1 %v618_v1  ;;  %v687_v0 = vld [vmem:[#allocation7 + $0x270] sm:$0xff]  ;;  %v592_v1 = vsel %vm303_vm6, %v588_v55, %v585_v54 }
 0x17a   :  { %v489_v15 = vmul.f32 %v1269_v3, %v1269_v3  ;;  %v479_v18 = vadd.f32 %v478_v14, %v1269_v3  ;;  %v1298_v14 = vld [vmem:[#allocation7 + $0x1d8] sm:$0xff] }
 0x17b   :  { %v399_v4 = vpop.f32.mrf.mxu1  ;;  %798 = vmatpush.msra.mxu0 %v1298_v14 }
 0x17c   :  { %v428_v11 = vpop.f32.mrf.mxu2  ;;  %v492_v21 = vadd.f32 %v491_v17, %v489_v15  ;;  %v616_v15 = vld [vmem:[#allocation7 + $0x38] sm:$0xff]  ;;  %v647_v17 = vld [vmem:[#allocation7 + $0x130] sm:$0xff] }
 0x17d   :  { %v429_v12 = vadd.f32 %v428_v11, %v399_v4  ;;  %v649_v4 = vld [vmem:[#allocation7 + $0x140] sm:$0xff] }
 0x17e   :  { %772 = vmatpush.msrb.mxu3 %v649_v4  ;;  %v617_v11 = vld [vmem:[#allocation7 + $0x40] sm:$0xff] }
 0x17f   :  { %v457_v16 = vpop.f32.mrf.mxu3  ;;  %714 = vmatpush.msrb.mxu1 %v617_v11  ;;  %v701_v4 = vld [vmem:[#allocation7 + $0x2e0] sm:$0xff] }
 0x180   :  { %v1280_v19 = vadd.f32 %v457_v16, %v429_v12  ;;  %v631_v12 = vld [vmem:[#allocation7 + $0xb0] sm:$0xff]  ;;  %v630_v16 = vld [vmem:[#allocation7 + $0xa8] sm:$0xff]  ;;  %773 = vmatpush.msrb.mxu3 %v648_v13 }
 0x181   :  { %745 = vmatpush.msrb.mxu2 %v631_v12  ;;  %715 = vmatpush.msrb.mxu1 %v616_v15  ;;  %v1345_v12 = vld [vmem:[#allocation7 + $0x188] sm:$0xff]  ;;  %v700_v15 = vld [vmem:[#allocation7 + $0x2d8] sm:$0xff] }
 0x182   :  { %v480_v22 = vadd.f32 %v479_v18, %v1280_v19  ;;  %v490_v23 = vmul.f32 %v1280_v19, %v1280_v19  ;;  %v1300_v18 = vld [vmem:[#allocation7 + $0x1d0] sm:$0xff]  ;;  %774 = vmatpush.msrb.mxu3 %v647_v17  ;;  %v1351_v17 = vld [vmem:[#allocation7 + $0x180] sm:$0xff] }
 0x183   :  { %746 = vmatpush.msrb.mxu2 %v630_v16  ;;  %799 = vmatpush.msra.mxu0 %v1300_v18  ;;  %v593_v16 = vmul.f32 %v1234_v9, %v592_v1 }
 0x184   :  { %v481_v24 = vrot.slane %v480_v22, 4  ;;  %v493_v25 = vadd.f32 %v492_v21, %v490_v23  ;;  %v629_v23 = vld [vmem:[#allocation7 + $0xa0] sm:$0xff] }
 0x185   :  { %747 = vmatpush.msrb.mxu2 %v629_v23 }
 0x186   :  { %v482_v26 = vadd.f32 %v481_v24, %v480_v22  ;;  %v494_v27 = vrot.slane %v493_v25, 4  ;;  %v615_v22 = vld [vmem:[#allocation7 + $0x30] sm:$0xff]  ;;  %v646_v24 = vld [vmem:[#allocation7 + $0x128] sm:$0xff] }
 0x187   :  { %716 = vmatpush.msrb.mxu1 %v615_v22  ;;  %775 = vmatpush.msrb.mxu3 %v646_v24  ;;  %v699_v22 = vld [vmem:[#allocation7 + $0x2d0] sm:$0xff]  ;;  %v684_v24 = vld [vmem:[#allocation7 + $0x258] sm:$0xff] }
 0x188   :  { %v483_v28 = vrot.slane %v482_v26, 2  ;;  %v495_v29 = vadd.f32 %v494_v27, %v493_v25  ;;  %v628_v27 = vld [vmem:[#allocation7 + $0x98] sm:$0xff] }
 0x189   :  { %748 = vmatpush.msrb.mxu2 %v628_v27  ;;  %v698_v27 = vld [vmem:[#allocation7 + $0x2c8] sm:$0xff] }
 0x18a   :  { %v484_v31 = vadd.f32 %v483_v28, %v482_v26  ;;  %v496_v32 = vrot.slane %v495_v29, 2  ;;  %v1305_v26 = vld [vmem:[#allocation7 + $0x1c8] sm:$0xff] }
 0x18b   :  { %v614_v28 = vld [vmem:[#allocation7 + $0x28] sm:$0xff]  ;;  %800 = vmatpush.msra.mxu0 %v1305_v26 }
 0x18c   :  { %v485_v33 = vrot.slane %v484_v31, 1  ;;  %v497_v35 = vadd.f32 %v496_v32, %v495_v29  ;;  %v645_v29 = vld [vmem:[#allocation7 + $0x120] sm:$0xff]  ;;  %717 = vmatpush.msrb.mxu1 %v614_v28 }
 0x18d   :  { %v1310_v32 = vld [vmem:[#allocation7 + $0x1c0] sm:$0xff]  ;;  %776 = vmatpush.msrb.mxu3 %v645_v29 }
 0x18e   :  { %v498_v36 = vrot.slane %v497_v35, 1  ;;  %v486_v37 = vadd.f32 %v485_v33, %v484_v31  ;;  %v627_v33 = vld [vmem:[#allocation7 + $0x90] sm:$0xff]  ;;  %801 = vmatpush.msra.mxu0 %v1310_v32  ;;  %v697_v29 = vld [vmem:[#allocation7 + $0x2c0] sm:$0xff] }
 0x18f   :  { %749 = vmatpush.msrb.mxu2 %v627_v33 }
 0x190   :  { %v499_v38 = vadd.f32 %v498_v36, %v497_v35  ;;  %v613_v35 = vld [vmem:[#allocation7 + $0x20] sm:$0xff]  ;;  %v644_v36 = vld [vmem:[#allocation7 + $0x118] sm:$0xff] }
 0x191   :  { %718 = vmatpush.msrb.mxu1 %v613_v35  ;;  %777 = vmatpush.msrb.mxu3 %v644_v36 }
 0x192   :  { %v500_v39 = vsel %vm237_vm0, %v486_v37, %v499_v38  ;;  %v1313_v38 = vld [vmem:[#allocation7 + $0x1b8] sm:$0xff] }
 0x193   :  { %517 = vmatmul.f32.vlgmr.msrb.gmra.mxu0 %v500_v39  ;;  %v626_v39 = vld [vmem:[#allocation7 + $0x88] sm:$0xff]  ;;  %719 = vmatpush.msrb.mxu1 %v612_v40 }
 0x194   :  { %802 = vmatpush.msra.mxu0 %v1313_v38  ;;  %750 = vmatpush.msrb.mxu2 %v626_v39  ;;  %v695_v39 = vld [vmem:[#allocation7 + $0x2b0] sm:$0xff] }
 0x195   :  { %778 = vmatpush.msrb.mxu3 %v643_v41  ;;  %720 = vmatpush.msrb.mxu1 %v611_v45  ;;  %v680_v41 = vld [vmem:[#allocation7 + $0x238] sm:$0xff] }
 0x196   :  { %803 = vmatpush.msra.mxu0 %v1317_v43  ;;  %751 = vmatpush.msrb.mxu2 %v625_v44  ;;  %v679_v44 = vld [vmem:[#allocation7 + $0x230] sm:$0xff] }
 0x197   :  { %779 = vmatpush.msrb.mxu3 %v642_v47  ;;  %721 = vmatpush.msrb.mxu1 %v610_v50 }
 0x198   :  { %804 = vmatpush.msra.mxu0 %v1322_v49  ;;  %852 = vmatpush.msra.mxu2 %v704_v51  ;;  %v678_v51 = vld [vmem:[#allocation7 + $0x228] sm:$0xff] }
 0x199   :  { %780 = vmatpush.msrb.mxu3 %v641_v52  ;;  %722 = vmatpush.msrb.mxu1 %v609_v57  ;;  %v692_v52 = vld [vmem:[#allocation7 + $0x298] sm:$0xff] }
 0x19a   :  { %805 = vmatpush.msra.mxu0 %v1326_v53  ;;  %853 = vmatpush.msra.mxu2 %v703_v58 }
 0x19b   :  { %911 = vmatpush.msra.mxu3 %v1286_v56  ;;  %823 = vmatpush.msra.mxu1 %v688_v61  ;;  %v686_v56 = vld [vmem:[#allocation7 + $0x268] sm:$0xff] }
 0x19c   :  { %806 = vmatpush.msra.mxu0 %v1331_v59  ;;  %854 = vmatpush.msra.mxu2 %v702_v62 }
 0x19d   :  { %912 = vmatpush.msra.mxu3 %v1289_v60  ;;  %824 = vmatpush.msra.mxu1 %v687_v0  ;;  %v685_v60 = vld [vmem:[#allocation7 + $0x260] sm:$0xff] }
 0x19e   :  { %807 = vmatpush.msra.mxu0 %v1335_v63  ;;  %855 = vmatpush.msra.mxu2 %v701_v4 }
 0x19f   :  { %913 = vmatpush.msra.mxu3 %v1292_v6  ;;  %825 = vmatpush.msra.mxu1 %v686_v56  ;;  %v683_v6 = vld [vmem:[#allocation7 + $0x250] sm:$0xff] }
 0x1a0   :  { %808 = vmatpush.msra.mxu0 %v1345_v12  ;;  %856 = vmatpush.msra.mxu2 %v700_v15 }
 0x1a1   :  { %914 = vmatpush.msra.mxu3 %v1295_v10  ;;  %826 = vmatpush.msra.mxu1 %v685_v60  ;;  %v696_v10 = vld [vmem:[#allocation7 + $0x2b8] sm:$0xff] }
 0x1a2   :  { %809 = vmatpush.msra.mxu0 %v1351_v17  ;;  %857 = vmatpush.msra.mxu2 %v699_v22 }
 0x1a3   :  { %810 = vmatmul.f32.vlgmr.msra.gmra.mxu0 %v593_v16  ;;  %915 = vmatpush.msra.mxu3 %v1298_v14  ;;  %v681_v14 = vld [vmem:[#allocation7 + $0x240] sm:$0xff] }
 0x1a4   :  { %827 = vmatpush.msra.mxu1 %v684_v24  ;;  %858 = vmatpush.msra.mxu2 %v698_v27  ;;  %v674_v27 = vld [vmem:[#allocation7 + $0x208] sm:$0xff] }
 0x1a5   :  { %916 = vmatpush.msra.mxu3 %v1300_v18  ;;  %v694_v18 = vld [vmem:[#allocation7 + $0x2a8] sm:$0xff] }
 0x1a6   :  { %828 = vmatpush.msra.mxu1 %v683_v6  ;;  %859 = vmatpush.msra.mxu2 %v697_v29  ;;  %v673_v6 = vld [vmem:[#allocation7 + $0x200] sm:$0xff] }
 0x1a7   :  { %917 = vmatpush.msra.mxu3 %v1305_v26 }
 0x1a8   :  { %860 = vmatpush.msra.mxu2 %v696_v10 }
 0x1a9   :  { %918 = vmatpush.msra.mxu3 %v1310_v32  ;;  %v938_v32 = vld [vmem:[#allocation8 + $0x3] ss:$0 sm:$0xff] }
 0x1aa   :  { %861 = vmatpush.msra.mxu2 %v695_v39  ;;  %v945_v39 = vld [vmem:[#allocation2 + $0x8] sm:$0xff] }
 0x1ab   :  { %919 = vmatpush.msra.mxu3 %v1313_v38 }
 0x1ac   :  { %862 = vmatpush.msra.mxu2 %v694_v18  ;;  %v586_v18 = vrot.slane %v945_v39, 7 }
 0x1ad   :  { %920 = vmatpush.msra.mxu3 %v1317_v43  ;;  %v676_v43 = vld [vmem:[#allocation7 + $0x218] sm:$0xff] }
 0x1af   :  { %921 = vmatpush.msra.mxu3 %v1322_v49  ;;  %v675_v49 = vld [vmem:[#allocation7 + $0x210] sm:$0xff] }
 0x1b1   :  { %922 = vmatpush.msra.mxu3 %v1326_v53  ;;  %v689_v53 = vld [vmem:[#allocation7 + $0x280] sm:$0xff] }
 0x1b3   :  { %923 = vmatpush.msra.mxu3 %v1331_v59 }
 0x1b5   :  { %924 = vmatpush.msra.mxu3 %v1335_v63 }
 0x1b7   :  { %925 = vmatpush.msra.mxu3 %v1345_v12 }
 0x1b9   :  { %926 = vmatpush.msra.mxu3 %v1351_v17 }
 0x210   :  { %v518_v21 = vpop.f32.mrf.mxu0 }
 0x211   :  { %v1303_v25 = vmul.f32 0.001953125, %v518_v21 }
 0x213   :  { %v522_v31 = vmul.f32 %v1303_v25, %v1303_v25  ;;  %v542_v36 = vperm.slane %v1303_v25, 0 }
 0x215   :  { %v524_v37 = vrot.slane %v522_v31, 7  ;;  %v682_v31 = vld [vmem:[#allocation7 + $0x248] sm:$0xff]  ;;  %v544_v45 = vsub.f32 %v1265_v2, %v542_v36  ;;  %v545_v26 = vsub.f32 %v1269_v3, %v542_v36  ;;  %v543_v47 = vsub.f32 %v1267_v7, %v542_v36  ;;  %v677_v3 = vld [vmem:[#allocation7 + $0x220] sm:$0xff] }
 0x216   :  { %829 = vmatpush.msra.mxu1 %v682_v31 }
 0x217   :  { %v526_v42 = vsub.f32 %v1303_v25, %v524_v37  ;;  %v476_v37 = vld [vmem:[#allocation8 + $0x2] sm:$0x1] }
 0x218   :  { %830 = vmatpush.msra.mxu1 %v681_v14  ;;  %v693_v25 = vld [vmem:[#allocation7 + $0x2a0] sm:$0xff] }
 0x219   :  { %v1320_v46 = vadd.f32 1e-05, %v526_v42  ;;  %863 = vmatpush.msra.mxu2 %v693_v25  ;;  %v591_v25 = vsel %vm303_vm6, %v585_v54, %v586_v18 }
 0x21a   :  { %831 = vmatpush.msra.mxu1 %v680_v41 }
 0x21b   :  { %942 = vrsqrt.f32 %v1320_v46  ;;  %vm534_vm11 = vweird.f32 %v1320_v46  ;;  %864 = vmatpush.msra.mxu2 %v692_v52 }
 0x21c   :  { %832 = vmatpush.msra.mxu1 %v679_v44  ;;  %v946_v44 = vld [vmem:[#allocation2 + $0x10] sm:$0xff] }
 0x21e   :  { %833 = vmatpush.msra.mxu1 %v678_v51  ;;  %v947_v51 = vld [vmem:[#allocation2 + $0x18] sm:$0xff] }
 0x21f   :  { %v600_v52 = vrot.slane %v947_v51, 1 }
 0x220   :  { %834 = vmatpush.msra.mxu1 %v677_v3 }
 0x221   :  { %v943_v11 = vpop.eup %942 }
 0x222   :  { %v529_v13 = vmul.f32 %v943_v11, %v1320_v46  ;;  %vm535_vm10 = vweird.f32 %v943_v11  ;;  %v546_v46 = vsub.f32 %v1280_v19, %v542_v36  ;;  %v691_v19 = vld [vmem:[#allocation7 + $0x290] sm:$0xff]  ;;  %835 = vmatpush.msra.mxu1 %v676_v43 }
 0x223   :  { %vm536_vm12 = vmor %vm534_vm11, %vm535_vm10  ;;  %865 = vmatpush.msra.mxu2 %v691_v19 }
 0x224   :  { %v530_v21 = vmul.f32 %v943_v11, %v529_v13  ;;  %v690_v13 = vld [vmem:[#allocation7 + $0x288] sm:$0xff]  ;;  %836 = vmatpush.msra.mxu1 %v675_v49 }
 0x225   :  { %866 = vmatpush.msra.mxu2 %v690_v13 }
 0x226   :  { %v531_v23 = vmul.f32 0.5, %v530_v21  ;;  %837 = vmatpush.msra.mxu1 %v674_v27 }
 0x227   :  { %867 = vmatpush.msra.mxu2 %v689_v53 }
 0x228   :  { %v532_v28 = vsub.f32 1.5, %v531_v23  ;;  %838 = vmatpush.msra.mxu1 %v673_v6 }
 0x22a   :  { %v533_v33 = vmul.f32 %v943_v11, %v532_v28 }
 0x22c   :  { %v537_v35 = vsel %vm536_vm12, %v943_v11, %v533_v33 }
 0x22d   :  { %v539_v40 = vrot.slane %v537_v35, 1 }
 0x22f   :  { %v541_v42 = vmul.f32 %v539_v40, %v476_v37  ;;  %v944_v37 = vld [vmem:[#allocation2] sm:$0xff]  ;;  %v598_v40 = vrot.slane %v945_v39, 1 }
 0x230   :  { %v597_v14 = vrot.slane %v944_v37, 1 }
 0x231   :  { %v547_v50 = vperm.slane %v541_v42, 0 }
 0x232   :  { %v603_v42 = vsel %vm316_vm5, %v597_v14, %v598_v40  ;;  %v604_v54 = vsel %vm316_vm5, %v600_v52, %v597_v14 }
 0x233   :  { %v548_v57 = vmul.f32 %v547_v50, %v543_v47  ;;  %v549_v2 = vmul.f32 %v547_v50, %v544_v45  ;;  %v551_v58 = vmul.f32 %v547_v50, %v546_v46  ;;  %v550_v38 = vmul.f32 %v547_v50, %v545_v26 }
 0x234   :  { %v599_v45 = vrot.slane %v946_v44, 1  ;;  %v587_v26 = vrot.slane %v946_v44, 7 }
 0x235   :  { %v553_v61 = vadd.f32 %v938_v32, %v548_v57  ;;  %v554_v7 = vadd.f32 %v938_v32, %v549_v2  ;;  %v556_v62 = vadd.f32 %v938_v32, %v551_v58  ;;  %v555_v0 = vadd.f32 %v938_v32, %v550_v38 }
 0x236   :  { %v602_v46 = vsel %vm316_vm5, %v598_v40, %v599_v45  ;;  %v590_v50 = vsel %vm303_vm6, %v586_v18, %v587_v26  ;;  %v601_v5 = vsel %vm316_vm5, %v599_v45, %v600_v52 }
 0x237   :  { %v557_v1 = vmax.f32 %v553_v61, 0.0  ;;  %v558_v4 = vmax.f32 %v554_v7, 0.0  ;;  %v560_v11 = vmax.f32 %v556_v62, 0.0  ;;  %v559_v56 = vmax.f32 %v555_v0, 0.0  ;;  %v939_v61 = vld [vmem:[#allocation8 + $0x4] ss:$0 sm:$0xff] }
 0x238   :  { %v606_v47 = vmul.f32 %v1243_v20, %v602_v46  ;;  %v595_v32 = vmul.f32 %v1251_v30, %v590_v50 }
 0x239   :  { %v561_v15 = vrot.slane %v557_v1, 7  ;;  %752 = vmatmul.f32.vlgmr.msrb.gmra.mxu2 %v557_v1  ;;  %v573_v16 = vrot.slane %v557_v1, 1  ;;  %v574_v21 = vrot.slane %v558_v4, 1  ;;  %v564_v60 = vrot.slane %v560_v11, 7 }
 0x23a   :  { %v575_v24 = vrot.slane %v559_v56, 1  ;;  %v562_v28 = vrot.slane %v558_v4, 7  ;;  %v563_v31 = vrot.slane %v559_v56, 7  ;;  %v576_v33 = vrot.slane %v560_v11, 1 }
 0x23b   :  { %v579_v22 = vsel %vm316_vm5, %v573_v16, %v574_v21  ;;  %v568_v23 = vsel %vm303_vm6, %v564_v60, %v561_v15 }
 0x23c   :  { %781 = vmatmul.f32.vlgmr.msrb.gmra.mxu3 %v579_v22  ;;  %v569_v59 = vmul.f32 %v1234_v9, %v568_v23  ;;  %v578_v63 = vsel %vm316_vm5, %v574_v21, %v575_v24  ;;  %v567_v9 = vsel %vm303_vm6, %v561_v15, %v562_v28  ;;  %v566_v12 = vsel %vm303_vm6, %v562_v28, %v563_v31 }
 0x23d   :  { %v582_v29 = vmul.f32 %v1243_v20, %v578_v63  ;;  %v577_v10 = vsel %vm316_vm5, %v575_v24, %v576_v33  ;;  %v571_v17 = vmul.f32 %v1251_v30, %v566_v12  ;;  %v580_v35 = vsel %vm316_vm5, %v576_v33, %v573_v16 }
 0x23e   :  { %723 = vmatmul.f32.vlgmr.msrb.gmra.mxu1 %v569_v59  ;;  %v584_v36 = vmul.f32 %v1258_v34, %v580_v35  ;;  %v565_v41 = vsel %vm303_vm6, %v563_v31, %v564_v60  ;;  %v589_v20 = vsel %vm303_vm6, %v587_v26, %v588_v55  ;;  %v608_v30 = vmul.f32 %v1258_v34, %v604_v54 }
 0x241   :  { %755 = vmatmul.f32.gmra.mxu2 %v558_v4  ;;  %v811_v4 = vpop.f32.mrf.mxu0 }
 0x244   :  { %784 = vmatmul.f32.gmra.mxu3 %v582_v29 }
 0x246   :  { %726 = vmatmul.f32.gmra.mxu1 %v567_v9 }
 0x249   :  { %758 = vmatmul.f32.gmra.mxu2 %v559_v56 }
 0x24c   :  { %787 = vmatmul.f32.gmra.mxu3 %v577_v10 }
 0x24e   :  { %729 = vmatmul.f32.gmra.mxu1 %v571_v17 }
 0x251   :  { %761 = vmatmul.f32.gmra.mxu2 %v560_v11 }
 0x254   :  { %790 = vmatmul.f32.gmra.mxu3 %v584_v36 }
 0x256   :  { %732 = vmatmul.f32.gmra.mxu1 %v565_v41 }
 0x259   :  { %868 = vmatmul.f32.vlgmr.msra.gmra.mxu2 %v603_v42 }
 0x25c   :  { %813 = vmatmul.f32.vlgmr.msra.gmra.mxu3 %v591_v25 }
 0x25e   :  { %839 = vmatmul.f32.vlgmr.msra.gmra.mxu1 %v944_v37 }
 0x261   :  { %871 = vmatmul.f32.gmra.mxu2 %v606_v47 }
 0x264   :  { %816 = vmatmul.f32.gmra.mxu3 %v595_v32 }
 0x266   :  { %842 = vmatmul.f32.gmra.mxu1 %v945_v39 }
 0x269   :  { %874 = vmatmul.f32.gmra.mxu2 %v601_v5 }
 0x26c   :  { %819 = vmatmul.f32.gmra.mxu3 %v589_v20 }
 0x26e   :  { %845 = vmatmul.f32.gmra.mxu1 %v946_v44 }
 0x271   :  { %877 = vmatmul.f32.gmra.mxu2 %v608_v30 }
 0x276   :  { %848 = vmatmul.f32.gmra.mxu1 %v947_v51 }
 0x2bb   :  { %v724_v57 = vpop.f32.mrf.mxu1 }
 0x2bc   :  { %v753_v2 = vpop.f32.mrf.mxu2  ;;  %v725_v62 = vadd.f32 %v939_v61, %v724_v57 }
 0x2be   :  { %v754_v0 = vadd.f32 %v753_v2, %v725_v62 }
 0x2bf   :  { %v782_v58 = vpop.f32.mrf.mxu3 }
 0x2c0   :  { %v783_v1 = vadd.f32 %v782_v58, %v754_v0 }
 0x2c2   :  { %v812_v56 = vadd.f32 %v811_v4, %v783_v1 }
 0x2c3   :  { %v727_v38 = vpop.f32.mrf.mxu1 }
 0x2c4   :  { %v756_v3 = vpop.f32.mrf.mxu2  ;;  %v728_v11 = vadd.f32 %v939_v61, %v727_v38 }
 0x2c6   :  { %v757_v49 = vadd.f32 %v756_v3, %v728_v11 }
 0x2c7   :  { %v785_v19 = vpop.f32.mrf.mxu3 }
 0x2c8   :  { %v786_v53 = vadd.f32 %v785_v19, %v757_v49 }
 0x2cb   :  { %v730_v8 = vpop.f32.mrf.mxu1 }
 0x2cc   :  { %v759_v7 = vpop.f32.mrf.mxu2  ;;  %v731_v22 = vadd.f32 %v939_v61, %v730_v8 }
 0x2ce   :  { %v760_v59 = vadd.f32 %v759_v7, %v731_v22 }
 0x2cf   :  { %v788_v55 = vpop.f32.mrf.mxu3 }
 0x2d0   :  { %v789_v29 = vadd.f32 %v788_v55, %v760_v59 }
 0x2d3   :  { %v733_v48 = vpop.f32.mrf.mxu1 }
 0x2d4   :  { %v762_v43 = vpop.f32.mrf.mxu2  ;;  %v734_v9 = vadd.f32 %v939_v61, %v733_v48 }
 0x2d6   :  { %v763_v12 = vadd.f32 %v762_v43, %v734_v9 }
 0x2d7   :  { %v791_v34 = vpop.f32.mrf.mxu3 }
 0x2d8   :  { %v792_v37 = vadd.f32 %v791_v34, %v763_v12 }
 0x2db   :  { %v840_v13 = vpop.f32.mrf.mxu1 }
 0x2dc   :  { %v841_v15 = vadd.f32 %v840_v13, %v812_v56  ;;  %v869_v16 = vpop.f32.mrf.mxu2 }
 0x2de   :  { %v870_v21 = vadd.f32 %v869_v16, %v841_v15 }
 0x2df   :  { %v814_v60 = vpop.f32.mrf.mxu3 }
 0x2e0   :  { %881 = vst [vmem:[#allocation13] sm:$0xff] %v870_v21  ;;  %v815_v23 = vadd.f32 %v814_v60, %v786_v53 }
 0x2e3   :  { %v843_v24 = vpop.f32.mrf.mxu1 }
 0x2e4   :  { %v844_v27 = vadd.f32 %v843_v24, %v815_v23  ;;  %v872_v6 = vpop.f32.mrf.mxu2 }
 0x2e6   :  { %v873_v63 = vadd.f32 %v872_v6, %v844_v27 }
 0x2e7   :  { %v817_v28 = vpop.f32.mrf.mxu3 }
 0x2e8   :  { %882 = vst [vmem:[#allocation13 + $0x8] sm:$0xff] %v873_v63  ;;  %v818_v31 = vadd.f32 %v817_v28, %v789_v29 }
 0x2eb   :  { %v846_v33 = vpop.f32.mrf.mxu1 }
 0x2ec   :  { %v847_v10 = vadd.f32 %v846_v33, %v818_v31  ;;  %v875_v17 = vpop.f32.mrf.mxu2 }
 0x2ee   :  { %v876_v35 = vadd.f32 %v875_v17, %v847_v10 }
 0x2ef   :  { %v820_v36 = vpop.f32.mrf.mxu3 }
 0x2f0   :  { %883 = vst [vmem:[#allocation13 + $0x10] sm:$0xff] %v876_v35  ;;  %v821_v14 = vadd.f32 %v820_v36, %v792_v37 }
 0x2f3   :  { %v849_v39 = vpop.f32.mrf.mxu1 }
 0x2f4   :  { %v850_v40 = vadd.f32 %v849_v39, %v821_v14  ;;  %v878_v41 = vpop.f32.mrf.mxu2 }
 0x2f6   :  { %v879_v18 = vadd.f32 %v878_v41, %v850_v40 }
 0x2f8   :  { %884 = vst [vmem:[#allocation13 + $0x18] sm:$0xff] %v879_v18 }
 0x2f9   :  { %897 = dma.vmem_to_hbm [thread:$0]  %s890_s24, 512, %s892_s27, [#allocation4], %s1127_s29, %s1127_s29, %s1128_s30  }
 0x2fa   :  { %1124 = dma.done.wait [#allocation4], 512  }
 0x2fb   :  { %1125 = vsyncadd [#allocation4], 4294966784 }
 0x2fc   :  { %902 = vsyncpa [#allocation3], 1 }
 0x2fd   :  { %903 = vsyncpa [#allocation6], 1 }
 0x2fe   :  { %904 = vsyncpa [#allocation9], 1 }
 0x2ff   :  { %905 = vsyncpa [#allocation12], 1 }
 0x300   :  { %906 = vsyncpa [#allocation4], 1 }

</bundles_post_ra>
